<compile_context>
chip_gen: v7x
topology: tpu7x:2x2x1
jax: 0.10.0
libtpu: 0.0.40
codegen_flags: <defaults>
</compile_context>

<pallas_src>
import jax
import jax.numpy as jnp
from jax.experimental import pallas as pl
from jax.experimental.pallas import tpu as pltpu

D_IN, D_H1, D_H2, D_OUT = 28 * 28, 128, 64, 10


def _round_up(x, m):
    return ((x + m - 1) // m) * m


def mlp_kernel(x_ref, w1_ref, b1_ref, w2_ref, b2_ref, w3_ref, b3_ref, o_ref):
    # f32 -> bf16 cast in VMEM (VALU has huge slack in this mem-bound kernel);
    # x is DMA'd as raw f32, so HBM only ever sees 4 B/elem of x once.
    x = x_ref[...].astype(w1_ref.dtype)

    # Layer 1: Linear + ReLU (bf16 MXU inputs, f32 accumulate; bias/ReLU f32).
    h1 = jnp.dot(x, w1_ref[...], preferred_element_type=jnp.float32)
    h1 = jnp.maximum(h1 + b1_ref[...], 0.0)
    # Dropout(0.2) -> identity in eval mode.

    # Layer 2: Linear + ReLU.
    h2 = jnp.dot(h1.astype(w2_ref.dtype), w2_ref[...],
                 preferred_element_type=jnp.float32)
    h2 = jnp.maximum(h2 + b2_ref[...], 0.0)
    # Dropout(0.2) -> identity in eval mode.

    # Layer 3: Linear (narrow N=10 output; masked store is ~3% of traffic).
    out = jnp.dot(h2.astype(w3_ref.dtype), w3_ref[...],
                  preferred_element_type=jnp.float32) + b3_ref[...]
    o_ref[...] = out.astype(o_ref.dtype)


def _pick_block_b(B, requested=None):
    """Per-generation batch tile: big enough to amortize the ~0.35us/step
    grid overhead, small enough to live inside the default scoped VMEM, and
    >= 2 grid steps on v7x so both TensorCores get work."""
    Bp = _round_up(B, 8)
    kind = ""
    try:
        kind = jax.devices()[0].device_kind.lower()
    except Exception:
        pass
    is_v7 = "v7" in kind
    cap = 2048 if (is_v7 or "v6" in kind) else 1024  # 32 MiB vs 16 MiB scoped VMEM

    if requested is not None:
        block_b = max(8, _round_up(requested, 8))
    else:
        block_b = min(cap, Bp)
        if is_v7 and Bp >= 16:
            # keep at least 2 grid steps so megacore shards the batch axis
            block_b = min(block_b, _round_up(-(-Bp // 2), 8))
    block_b = min(block_b, Bp)
    return Bp, block_b


def mlp_forward(x, w1, b1, w2, b2, w3, b3, *, block_b=None):
    """x: (B, 784) f32; weights in (in, out) layout; returns (B, 10) f32."""
    B, d_in = x.shape
    assert d_in == D_IN

    Bp, block_b = _pick_block_b(B, block_b)
    grid = (pl.cdiv(Bp, block_b),)

    # Only pad the batch axis, and only when needed (multiple of 8 sublanes).
    xp = x if Bp == B else jnp.pad(x, ((0, Bp - B), (0, 0)))

    # Weights to bf16 once (tiny, DMA'd once via grid-invariant index maps);
    # biases stay f32 for the f32 VPU add.
    bf = jnp.bfloat16
    w1c, w2c, w3c = w1.astype(bf), w2.astype(bf), w3.astype(bf)
    b1c, b2c, b3c = (b.astype(jnp.float32) for b in (b1, b2, b3))

    # Advisory cost hint for XLA's scheduler (kernel is small / DMA-bound).
    flops = 2 * Bp * (D_IN * D_H1 + D_H1 * D_H2 + D_H2 * D_OUT)
    bytes_accessed = (
        Bp * D_IN * 4                                             # x (f32)
        + (D_IN * D_H1 + D_H1 * D_H2 + D_H2 * D_OUT) * 2          # bf16 weights
        + (D_H1 + D_H2 + D_OUT) * 4                               # f32 biases
        + Bp * D_OUT * 4)                                         # output
    cost = pl.CostEstimate(flops=flops, transcendentals=0,
                           bytes_accessed=bytes_accessed)

    out = pl.pallas_call(
        mlp_kernel,
        out_shape=jax.ShapeDtypeStruct((Bp, D_OUT), jnp.float32),
        grid_spec=pltpu.PrefetchScalarGridSpec(
            num_scalar_prefetch=0,
            grid=grid,
            in_specs=[
                # activations tiled over batch (full-extent K=784 block);
                # weights/biases grid-invariant (block index constant -> the
                # pipeline DMAs them only once).
                pl.BlockSpec((block_b, D_IN), lambda i: (i, 0)),
                pl.BlockSpec((D_IN, D_H1), lambda i: (0, 0)),
                pl.BlockSpec((1, D_H1), lambda i: (0, 0)),
                pl.BlockSpec((D_H1, D_H2), lambda i: (0, 0)),
                pl.BlockSpec((1, D_H2), lambda i: (0, 0)),
                pl.BlockSpec((D_H2, D_OUT), lambda i: (0, 0)),
                pl.BlockSpec((1, D_OUT), lambda i: (0, 0)),
            ],
            out_specs=pl.BlockSpec((block_b, D_OUT), lambda i: (i, 0)),
        ),
        compiler_params=pltpu.CompilerParams(
            dimension_semantics=("parallel",),
        ),
        cost_estimate=cost,
    )(xp, w1c, b1c, w2c, b2c, w3c, b3c)

    return out if Bp == B else out[:B]


def init_params(key):
    """Deterministic init mimicking PyTorch nn.Linear default U(-1/sqrt(in), 1/sqrt(in))."""
    ks = jax.random.split(key, 6)

    def linear(kw, kb, d_in, d_out):
        bound = 1.0 / jnp.sqrt(d_in)
        w = jax.random.uniform(kw, (d_in, d_out), jnp.float32, -bound, bound)
        b = jax.random.uniform(kb, (1, d_out), jnp.float32, -bound, bound)
        return w, b

    w1, b1 = linear(ks[0], ks[1], D_IN, D_H1)
    w2, b2 = linear(ks[2], ks[3], D_H1, D_H2)
    w3, b3 = linear(ks[4], ks[5], D_H2, D_OUT)
    return w1, b1, w2, b2, w3, b3


if __name__ == "__main__":
    key = jax.random.PRNGKey(0)
    k_x, k_p = jax.random.split(key)

    # Small but MXU-meaningful demo batch; block_b=128 -> 2 grid steps
    # (exercises the tiled path and v7x's 2-TC sharding of the batch axis).
    B = 256
    x = jax.random.normal(k_x, (B, D_IN), jnp.float32)
    params = init_params(k_p)

    out = mlp_forward(x, *params, block_b=128)
    out = jax.block_until_ready(out)

    # Pure-JAX reference with matching numerics (bf16 MXU inputs, f32 accumulate).
    w1, b1, w2, b2, w3, b3 = params
    bf = jnp.bfloat16
    h1 = jnp.maximum(
        jnp.dot(x.astype(bf), w1.astype(bf),
                preferred_element_type=jnp.float32) + b1, 0.0)
    h2 = jnp.maximum(
        jnp.dot(h1.astype(bf), w2.astype(bf),
                preferred_element_type=jnp.float32) + b2, 0.0)
    ref = jnp.dot(h2.astype(bf), w3.astype(bf),
                  preferred_element_type=jnp.float32) + b3

    assert out.shape == (B, D_OUT)
    assert jnp.allclose(out, ref, atol=1e-2, rtol=1e-2), \
        float(jnp.max(jnp.abs(out - ref)))
    print("KERNEL_OK")
</pallas_src>

<mosaic_0001>
module attributes {stable_mosaic.version = 11 : i64} {
  func.func @mlp_kernel(%arg0: i32, %arg1: memref<128x784xf32, #tpu.memory_space<vmem>>, %arg2: memref<784x128xbf16, #tpu.memory_space<vmem>>, %arg3: memref<1x128xf32, #tpu.memory_space<vmem>>, %arg4: memref<128x64xbf16, #tpu.memory_space<vmem>>, %arg5: memref<1x64xf32, #tpu.memory_space<vmem>>, %arg6: memref<64x10xbf16, #tpu.memory_space<vmem>>, %arg7: memref<1x10xf32, #tpu.memory_space<vmem>>, %arg8: memref<128x10xf32, #tpu.memory_space<vmem>>) attributes {dimension_semantics = [#tpu.dimension_semantics<parallel>], iteration_bounds = array<i64: 2>, scalar_prefetch = 0 : i64, scratch_operands = 0 : i64, tpu.core_type = #tpu.core_type<tc>, window_params = [{transform_indices = @transform_0, window_bounds = array<i64: 128, 784>}, {pipeline_mode = #tpu.pipeline_mode<synchronous>, transform_indices = @transform_1, window_bounds = array<i64: 784, 128>}, {pipeline_mode = #tpu.pipeline_mode<synchronous>, transform_indices = @transform_2, window_bounds = array<i64: 1, 128>}, {pipeline_mode = #tpu.pipeline_mode<synchronous>, transform_indices = @transform_3, window_bounds = array<i64: 128, 64>}, {pipeline_mode = #tpu.pipeline_mode<synchronous>, transform_indices = @transform_4, window_bounds = array<i64: 1, 64>}, {pipeline_mode = #tpu.pipeline_mode<synchronous>, transform_indices = @transform_5, window_bounds = array<i64: 64, 10>}, {pipeline_mode = #tpu.pipeline_mode<synchronous>, transform_indices = @transform_6, window_bounds = array<i64: 1, 10>}, {transform_indices = @transform_7, window_bounds = array<i64: 128, 10>}]} {
    %c0 = arith.constant 0 : index
    %c0_0 = arith.constant 0 : index
    %0 = vector.load %arg1[%c0, %c0_0] : memref<128x784xf32, #tpu.memory_space<vmem>>, vector<128x784xf32>
    %1 = arith.truncf %0 : vector<128x784xf32> to vector<128x784xbf16>
    %c0_1 = arith.constant 0 : index
    %c0_2 = arith.constant 0 : index
    %2 = vector.load %arg2[%c0_1, %c0_2] : memref<784x128xbf16, #tpu.memory_space<vmem>>, vector<784x128xbf16>
    %cst = arith.constant dense<0.000000e+00> : vector<128x128xf32>
    %3 = tpu.matmul %1, %2, %cst {dimension_numbers = #tpu.dot_dimension_numbers<[1], [0], [0], [1], [0, 0, 1, 1], [], []>} : vector<128x784xbf16>, vector<784x128xbf16>, vector<128x128xf32> -> vector<128x128xf32>
    %c0_3 = arith.constant 0 : index
    %c0_4 = arith.constant 0 : index
    %4 = vector.load %arg3[%c0_3, %c0_4] : memref<1x128xf32, #tpu.memory_space<vmem>>, vector<1x128xf32>
    %5 = vector.broadcast %4 : vector<1x128xf32> to vector<128x128xf32>
    %6 = arith.addf %3, %5 : vector<128x128xf32>
    %cst_5 = arith.constant 0.000000e+00 : f32
    %7 = vector.broadcast %cst_5 : f32 to vector<128x128xf32>
    %8 = arith.maximumf %6, %7 : vector<128x128xf32>
    %9 = arith.truncf %8 : vector<128x128xf32> to vector<128x128xbf16>
    %c0_6 = arith.constant 0 : index
    %c0_7 = arith.constant 0 : index
    %10 = vector.load %arg4[%c0_6, %c0_7] : memref<128x64xbf16, #tpu.memory_space<vmem>>, vector<128x64xbf16>
    %cst_8 = arith.constant dense<0.000000e+00> : vector<128x64xf32>
    %11 = tpu.matmul %9, %10, %cst_8 {dimension_numbers = #tpu.dot_dimension_numbers<[1], [0], [0], [1], [0, 0, 1, 1], [], []>} : vector<128x128xbf16>, vector<128x64xbf16>, vector<128x64xf32> -> vector<128x64xf32>
    %c0_9 = arith.constant 0 : index
    %c0_10 = arith.constant 0 : index
    %12 = vector.load %arg5[%c0_9, %c0_10] : memref<1x64xf32, #tpu.memory_space<vmem>>, vector<1x64xf32>
    %13 = vector.broadcast %12 : vector<1x64xf32> to vector<128x64xf32>
    %14 = arith.addf %11, %13 : vector<128x64xf32>
    %cst_11 = arith.constant 0.000000e+00 : f32
    %15 = vector.broadcast %cst_11 : f32 to vector<128x64xf32>
    %16 = arith.maximumf %14, %15 : vector<128x64xf32>
    %17 = arith.truncf %16 : vector<128x64xf32> to vector<128x64xbf16>
    %c0_12 = arith.constant 0 : index
    %c0_13 = arith.constant 0 : index
    %18 = vector.load %arg6[%c0_12, %c0_13] : memref<64x10xbf16, #tpu.memory_space<vmem>>, vector<64x10xbf16>
    %cst_14 = arith.constant dense<0.000000e+00> : vector<128x10xf32>
    %19 = tpu.matmul %17, %18, %cst_14 {dimension_numbers = #tpu.dot_dimension_numbers<[1], [0], [0], [1], [0, 0, 1, 1], [], []>} : vector<128x64xbf16>, vector<64x10xbf16>, vector<128x10xf32> -> vector<128x10xf32>
    %c0_15 = arith.constant 0 : index
    %c0_16 = arith.constant 0 : index
    %20 = vector.load %arg7[%c0_15, %c0_16] : memref<1x10xf32, #tpu.memory_space<vmem>>, vector<1x10xf32>
    %21 = vector.broadcast %20 : vector<1x10xf32> to vector<128x10xf32>
    %22 = arith.addf %19, %21 : vector<128x10xf32>
    %c0_17 = arith.constant 0 : index
    %c0_18 = arith.constant 0 : index
    %23 = vector.load %arg8[%c0_17, %c0_18] : memref<128x10xf32, #tpu.memory_space<vmem>>, vector<128x10xf32>
    tpu.vector_store %arg8[%c0_17, %c0_18], %22 {strides = array<i32>} : memref<128x10xf32, #tpu.memory_space<vmem>>, vector<128x10xf32>,
    return
  }
  func.func @transform_0(%arg0: i32) -> (i32, i32) {
    %c0_i32 = arith.constant 0 : i32
    %c0_i32_0 = arith.constant 0 : i32
    return %arg0, %c0_i32 : i32, i32
  }
  func.func @transform_1(%arg0: i32) -> (i32, i32) {
    %c0_i32 = arith.constant 0 : i32
    %c0_i32_0 = arith.constant 0 : i32
    %c0_i32_1 = arith.constant 0 : i32
    return %c0_i32, %c0_i32_0 : i32, i32
  }
  func.func @transform_2(%arg0: i32) -> (i32, i32) {
    %c0_i32 = arith.constant 0 : i32
    %c0_i32_0 = arith.constant 0 : i32
    %c0_i32_1 = arith.constant 0 : i32
    return %c0_i32, %c0_i32_0 : i32, i32
  }
  func.func @transform_3(%arg0: i32) -> (i32, i32) {
    %c0_i32 = arith.constant 0 : i32
    %c0_i32_0 = arith.constant 0 : i32
    %c0_i32_1 = arith.constant 0 : i32
    return %c0_i32, %c0_i32_0 : i32, i32
  }
  func.func @transform_4(%arg0: i32) -> (i32, i32) {
    %c0_i32 = arith.constant 0 : i32
    %c0_i32_0 = arith.constant 0 : i32
    %c0_i32_1 = arith.constant 0 : i32
    return %c0_i32, %c0_i32_0 : i32, i32
  }
  func.func @transform_5(%arg0: i32) -> (i32, i32) {
    %c0_i32 = arith.constant 0 : i32
    %c0_i32_0 = arith.constant 0 : i32
    %c0_i32_1 = arith.constant 0 : i32
    return %c0_i32, %c0_i32_0 : i32, i32
  }
  func.func @transform_6(%arg0: i32) -> (i32, i32) {
    %c0_i32 = arith.constant 0 : i32
    %c0_i32_0 = arith.constant 0 : i32
    %c0_i32_1 = arith.constant 0 : i32
    return %c0_i32, %c0_i32_0 : i32, i32
  }
  func.func @transform_7(%arg0: i32) -> (i32, i32) {
    %c0_i32 = arith.constant 0 : i32
    %c0_i32_0 = arith.constant 0 : i32
    return %arg0, %c0_i32 : i32, i32
  }
}

</mosaic_0001>

<bundles_post_ra>
// kernel: tpu_custom_call.1
= control target key start
LH: loop header
LB: loop body
LE: loop exit
PB: predicated region body
PF: predicated region fallthrough
CT: control target
= control target key end

     0   :  { %s2244_s24 = smov 0   ;;  %s2689_s0 = inlined_call_operand.vmem [shape: f32[256,784], index: 0, kind: input, shape index: {}]   ;;  %s2690_s1 = inlined_call_operand.vmem [shape: bf16[784,128], index: 1, kind: input, shape index: {}]   ;;  %s2691_s2 = inlined_call_operand.vmem [shape: f32[1,128], index: 2, kind: input, shape index: {}]   ;;  %s2692_s3 = inlined_call_operand.vmem [shape: bf16[128,64], index: 3, kind: input, shape index: {}]   ;;  %s2693_s4 = inlined_call_operand.vmem [shape: f32[1,64], index: 4, kind: input, shape index: {}]   ;;  %s2694_s5 = inlined_call_operand.vmem [shape: bf16[64,10], index: 5, kind: input, shape index: {}]   ;;  %s2695_s6 = inlined_call_operand.vmem [shape: f32[1,10], index: 6, kind: input, shape index: {}]   ;;  %s2696_s7 = inlined_call_operand.vmem [shape: f32[256,10], index: 7, kind: output, shape index: {}]  }
   0x1 LB: > { %s1716_s25 = sadd.s32 4294967295, %s2202_s24   ;;  %p1720_p0 = scmp.ge.s32.totalorder %s2202_s24, 1  ;;  %s2202_s24 = sphi %s2244_s24, %s17_s24  }
   0x2   : > { %p239_p1 = scmp.lt.s32.totalorder %s2202_s24, 3 }
   0x4   : > { %p240_p2 = pnand %p1720_p0, %p239_p1 }
   0x5   : > { %v2135_v0 = vld [vmem:[%s2690_s1 + $0x40] sm:$0xff] (!%p240_p2)   ;;  %v2139_v4 = vld [vmem:[%s2690_s1 + $0x48] sm:$0xff] (!%p240_p2)   ;;  %v2143_v8 = vld [vmem:[%s2690_s1 + $0x50] sm:$0xff] (!%p240_p2)   ;;  %s1721_s12 = sshll.u32 (!%p240_p2), %s1716_s25, 4  ;;  %vm853_vm0 = vcmask (!%p240_p2), 130048   ;;  %vm1521_vm1 = vcmask (!%p240_p2), 523264  }
   0x6   : > { %243 = sbr.rel (%p240_p2) target bundleno = 816 (0x330), region = 48  ;;  %v2136_v1 = vld [vmem:[%s2690_s1 + $0xc0] sm:$0xff] (!%p240_p2)   ;;  %1807 = vmatprep.subr.bf16.mxu0 (!%p240_p2), %v2135_v0  ;;  %v2140_v5 = vld [vmem:[%s2690_s1 + $0xc8] sm:$0xff] (!%p240_p2)   ;;  %v2144_v9 = vld [vmem:[%s2690_s1 + $0xd0] sm:$0xff] (!%p240_p2)   ;;  %p273_p3 = scmp.lt.s32.totalorder (!%p240_p2), %s1721_s12, 31  ;;  %vm1643_vm2 = vcmask (!%p240_p2), 80896  }
   0x7   : > { %v2137_v2 = vld [vmem:[%s2690_s1] sm:$0xff] (!%p240_p2)   ;;  %1871 = vmatprep.subr.bf16.mxu1 (!%p240_p2), %v2136_v1  ;;  %v2141_v6 = vld [vmem:[%s2690_s1 + $0x8] sm:$0xff] (!%p240_p2)   ;;  %v2145_v10 = vld [vmem:[%s2690_s1 + $0x10] sm:$0xff] (!%p240_p2)  }
   0x8   : > { %v2138_v3 = vld [vmem:[%s2690_s1 + $0x80] sm:$0xff] (!%p240_p2)   ;;  %1808 = vmatpush3.bf16.msra.mxu0 (!%p240_p2), %v2137_v2  ;;  %v2142_v7 = vld [vmem:[%s2690_s1 + $0x88] sm:$0xff] (!%p240_p2)   ;;  %v2146_v11 = vld [vmem:[%s2690_s1 + $0x90] sm:$0xff] (!%p240_p2)  }
   0x9   : > { %1872 = vmatpush3.bf16.msra.mxu1 (!%p240_p2), %v2138_v3  ;;  %1809 = vmatprep.subr.bf16.mxu0 (!%p240_p2), %v2139_v4  ;;  %v2147_v12 = vld [vmem:[%s2690_s1 + $0x58] sm:$0xff] (!%p240_p2)   ;;  %v2151_v16 = vld [vmem:[%s2690_s1 + $0x60] sm:$0xff] (!%p240_p2)   ;;  %v2155_v20 = vld [vmem:[%s2690_s1 + $0x68] sm:$0xff] (!%p240_p2)  }
   0xa   : > { %1873 = vmatprep.subr.bf16.mxu1 (!%p240_p2), %v2140_v5  ;;  %v2148_v13 = vld [vmem:[%s2690_s1 + $0xd8] sm:$0xff] (!%p240_p2)   ;;  %v2152_v17 = vld [vmem:[%s2690_s1 + $0xe0] sm:$0xff] (!%p240_p2)   ;;  %v2156_v21 = vld [vmem:[%s2690_s1 + $0xe8] sm:$0xff] (!%p240_p2)  }
   0xb   : > { %v2149_v14 = vld [vmem:[%s2690_s1 + $0x18] sm:$0xff] (!%p240_p2)   ;;  %v2153_v18 = vld [vmem:[%s2690_s1 + $0x20] sm:$0xff] (!%p240_p2)   ;;  %v2157_v22 = vld [vmem:[%s2690_s1 + $0x28] sm:$0xff] (!%p240_p2)  }
   0xc   : > { %1810 = vmatpush3.bf16.msra.mxu0 (!%p240_p2), %v2141_v6  ;;  %v2150_v15 = vld [vmem:[%s2690_s1 + $0x98] sm:$0xff] (!%p240_p2)   ;;  %v2154_v19 = vld [vmem:[%s2690_s1 + $0xa0] sm:$0xff] (!%p240_p2)   ;;  %v2158_v23 = vld [vmem:[%s2690_s1 + $0xa8] sm:$0xff] (!%p240_p2)  }
   0xd   : > { %1874 = vmatpush3.bf16.msra.mxu1 %v2142_v7  ;;  %1811 = vmatprep.subr.bf16.mxu0 %v2143_v8  ;;  %s2698_s12 = smov (!%p273_p3, %s1721_s12), 31  ;;  %v2159_v24 = vld [vmem:[%s2690_s1 + $0x70] sm:$0xff]   ;;  %v2163_v28 = vld [vmem:[%s2690_s1 + $0x78] sm:$0xff]   ;;  %v2167_v44 = vld [vmem:[%s2690_s1 + $0x140] sm:$0xff]  }
   0xe   : > { %1875 = vmatprep.subr.bf16.mxu1 %v2144_v9  ;;  %v2160_v25 = vld [vmem:[%s2690_s1 + $0xf0] sm:$0xff]   ;;  %s2126_s14 = smul.u32 56, %s2698_s12  ;;  %v2164_v29 = vld [vmem:[%s2690_s1 + $0xf8] sm:$0xff]   ;;  %v2168_v45 = vld [vmem:[%s2690_s1 + $0x100] sm:$0xff]   ;;  %s1724_s8 = sshll.u32 %s2698_s12, 3 }
   0xf   : > { %v2161_v26 = vld [vmem:[%s2690_s1 + $0x30] sm:$0xff]   ;;  %v2165_v30 = vld [vmem:[%s2690_s1 + $0x38] sm:$0xff]   ;;  %v2169_v57 = vld [vmem:[%s2690_s1 + $0x148] sm:$0xff]  }
  0x10   : > { %1812 = vmatpush3.bf16.msra.mxu0 %v2145_v10  ;;  %v2162_v27 = vld [vmem:[%s2690_s1 + $0xb0] sm:$0xff]   ;;  %s2350_s26 = scalar_lea.vmem %s2689_s0, %s2126_s14  ;;  %v2166_v31 = vld [vmem:[%s2690_s1 + $0xb8] sm:$0xff]   ;;  %v2170_v59 = vld [vmem:[%s2690_s1 + $0x108] sm:$0xff]   ;;  %s2652_s14 = scalar_lea.vmem %s2696_s7, %s1724_s8 }
  0x11   : > { %1876 = vmatpush3.bf16.msra.mxu1 %v2146_v11  ;;  %1813 = vmatprep.subr.bf16.mxu0 %v2147_v12  ;;  %v287_v32 = vld [vmem:[%s2350_s26 + $0x8] sm:$0xff]  ;;  %v294_v33 = vld [vmem:[%s2350_s26 + $0x40] sm:$0xff]  ;;  %v289_v34 = vld [vmem:[%s2350_s26 + $0x18] sm:$0xff] }
  0x12   : > { %1877 = vmatprep.subr.bf16.mxu1 %v2148_v13  ;;  %v399_v35 = vpack.c.bf16 %v294_v33, %v287_v32  ;;  %v296_v36 = vld [vmem:[%s2350_s26 + $0x50] sm:$0xff]  ;;  %v286_v37 = vld [vmem:[%s2350_s26] sm:$0xff]  ;;  %v293_v38 = vld [vmem:[%s2350_s26 + $0x38] sm:$0xff] }
  0x13   : > { %v401_v39 = vpack.c.bf16 %v296_v36, %v289_v34  ;;  %v398_v40 = vpack.c.bf16 %v293_v38, %v286_v37  ;;  %v288_v41 = vld [vmem:[%s2350_s26 + $0x10] sm:$0xff]  ;;  %v295_v42 = vld [vmem:[%s2350_s26 + $0x48] sm:$0xff]  ;;  %v301_v46 = vld [vmem:[%s2350_s26 + $0x78] sm:$0xff] }
  0x14   : > { %1814 = vmatpush3.bf16.msra.mxu0 %v2149_v14  ;;  %910 = vmatprep.mubr.bf16.mxu0 %v399_v35  ;;  %v400_v43 = vpack.c.bf16 %v295_v42, %v288_v41  ;;  %v308_v47 = vld [vmem:[%s2350_s26 + $0xb0] sm:$0xff]  ;;  %v303_v48 = vld [vmem:[%s2350_s26 + $0x88] sm:$0xff]  ;;  %v310_v49 = vld [vmem:[%s2350_s26 + $0xc0] sm:$0xff] }
  0x15   : > { %1878 = vmatpush3.bf16.msra.mxu1 %v2150_v15  ;;  %1815 = vmatprep.subr.bf16.mxu0 %v2151_v16  ;;  %v406_v50 = vpack.c.bf16 %v308_v47, %v301_v46  ;;  %v408_v51 = vpack.c.bf16 %v310_v49, %v303_v48  ;;  %v300_v52 = vld [vmem:[%s2350_s26 + $0x70] sm:$0xff]  ;;  %v307_v53 = vld [vmem:[%s2350_s26 + $0xa8] sm:$0xff]  ;;  %v302_v54 = vld [vmem:[%s2350_s26 + $0x80] sm:$0xff] }
  0x16   : > { %1879 = vmatprep.subr.bf16.mxu1 %v2152_v17  ;;  %1007 = vmatprep.mubr.bf16.mxu1 %v401_v39  ;;  %v309_v55 = vld [vmem:[%s2350_s26 + $0xb8] sm:$0xff]  ;;  %v405_v56 = vpack.c.bf16 %v307_v53, %v300_v52  ;;  %v315_v60 = vld [vmem:[%s2350_s26 + $0xe8] sm:$0xff]  ;;  %v322_v61 = vld [vmem:[%s2350_s26 + $0x120] sm:$0xff] }
  0x17   : > { %v407_v58 = vpack.c.bf16 %v309_v55, %v302_v54  ;;  %v413_v62 = vpack.c.bf16 %v322_v61, %v315_v60  ;;  %v317_v63 = vld [vmem:[%s2350_s26 + $0xf8] sm:$0xff]  ;;  %v324_v0 = vld [vmem:[%s2350_s26 + $0x130] sm:$0xff]  ;;  %v314_v2 = vld [vmem:[%s2350_s26 + $0xe0] sm:$0xff] }
  0x18   : > { %1816 = vmatpush3.bf16.msra.mxu0 %v2153_v18  ;;  %v415_v1 = vpack.c.bf16 %v324_v0, %v317_v63  ;;  %v321_v3 = vld [vmem:[%s2350_s26 + $0x118] sm:$0xff]  ;;  %v316_v4 = vld [vmem:[%s2350_s26 + $0xf0] sm:$0xff]  ;;  %v323_v7 = vld [vmem:[%s2350_s26 + $0x128] sm:$0xff] }
  0x19   : > { %1880 = vmatpush3.bf16.msra.mxu1 %v2154_v19  ;;  %1817 = vmatprep.subr.bf16.mxu0 %v2155_v20  ;;  %v2171_v5 = vld [vmem:[%s2690_s1 + $0x150] sm:$0xff]   ;;  %v329_v8 = vld [vmem:[%s2350_s26 + $0x158] sm:$0xff]  ;;  %v331_v10 = vld [vmem:[%s2350_s26 + $0x168] sm:$0xff]  ;;  %v412_v12 = vpack.c.bf16 %v321_v3, %v314_v2  ;;  %v414_v13 = vpack.c.bf16 %v323_v7, %v316_v4 }
  0x1a   : > { %1881 = vmatprep.subr.bf16.mxu1 %v2156_v21  ;;  %v2172_v6 = vld [vmem:[%s2690_s1 + $0x110] sm:$0xff]   ;;  %v338_v11 = vld [vmem:[%s2350_s26 + $0x1a0] sm:$0xff]  ;;  %v2173_v15 = vld [vmem:[%s2690_s1 + $0x158] sm:$0xff]  }
  0x1b   : > { %v336_v9 = vld [vmem:[%s2350_s26 + $0x190] sm:$0xff]  ;;  %v422_v16 = vpack.c.bf16 %v338_v11, %v331_v10  ;;  %v2174_v17 = vld [vmem:[%s2690_s1 + $0x118] sm:$0xff]   ;;  %v335_v19 = vld [vmem:[%s2350_s26 + $0x188] sm:$0xff] }
  0x1c   : > { %1818 = vmatpush3.bf16.msra.mxu0 %v2157_v22  ;;  %v420_v14 = vpack.c.bf16 %v336_v9, %v329_v8  ;;  %v328_v18 = vld [vmem:[%s2350_s26 + $0x150] sm:$0xff]  ;;  %v330_v20 = vld [vmem:[%s2350_s26 + $0x160] sm:$0xff]  ;;  %v337_v21 = vld [vmem:[%s2350_s26 + $0x198] sm:$0xff] }
  0x1d   : > { %1882 = vmatpush3.bf16.msra.mxu1 %v2158_v23  ;;  %1819 = vmatprep.subr.bf16.mxu0 %v2159_v24  ;;  %v343_v22 = vld [vmem:[%s2350_s26 + $0x1c8] sm:$0xff]  ;;  %v350_v23 = vld [vmem:[%s2350_s26 + $0x200] sm:$0xff]  ;;  %v349_v35 = vld [vmem:[%s2350_s26 + $0x1f8] sm:$0xff] }
  0x1e   : > { %1883 = vmatprep.subr.bf16.mxu1 %v2160_v25  ;;  %v2175_v24 = vld [vmem:[%s2690_s1 + $0x160] sm:$0xff]   ;;  %v345_v25 = vld [vmem:[%s2350_s26 + $0x1d8] sm:$0xff]  ;;  %v2177_v32 = vld [vmem:[%s2690_s1 + $0x168] sm:$0xff]  }
  0x1f   : > { %v2178_v33 = vld [vmem:[%s2690_s1 + $0x128] sm:$0xff]   ;;  %v342_v34 = vld [vmem:[%s2350_s26 + $0x1c0] sm:$0xff]  ;;  %v344_v36 = vld [vmem:[%s2350_s26 + $0x1d0] sm:$0xff] }
  0x20   : > { %1820 = vmatpush3.bf16.msra.mxu0 %v2161_v26  ;;  %v352_v26 = vld [vmem:[%s2350_s26 + $0x210] sm:$0xff]  ;;  %v351_v37 = vld [vmem:[%s2350_s26 + $0x208] sm:$0xff]  ;;  %v357_v38 = vld [vmem:[%s2350_s26 + $0x238] sm:$0xff] }
  0x21   : > { %1884 = vmatpush3.bf16.msra.mxu1 %v2162_v27  ;;  %1821 = vmatprep.subr.bf16.mxu0 %v2163_v28  ;;  %v2176_v27 = vld [vmem:[%s2690_s1 + $0x120] sm:$0xff]   ;;  %v419_v28 = vpack.c.bf16 %v335_v19, %v328_v18  ;;  %v364_v39 = vld [vmem:[%s2350_s26 + $0x270] sm:$0xff]  ;;  %v2181_v49 = vld [vmem:[%s2690_s1 + $0x178] sm:$0xff]  }
  0x22   : > { %1885 = vmatprep.subr.bf16.mxu1 %v2164_v29  ;;  %v421_v29 = vpack.c.bf16 %v337_v21, %v330_v20  ;;  %v366_v41 = vld [vmem:[%s2350_s26 + $0x280] sm:$0xff]  ;;  %v2179_v42 = vld [vmem:[%s2690_s1 + $0x170] sm:$0xff]   ;;  %v434_v46 = vpack.c.bf16 %v364_v39, %v357_v38  ;;  %v2182_v52 = vld [vmem:[%s2690_s1 + $0x138] sm:$0xff]  }
  0x23   : > { %v356_v48 = vld [vmem:[%s2350_s26 + $0x230] sm:$0xff]  ;;  %v365_v53 = vld [vmem:[%s2350_s26 + $0x278] sm:$0xff]  ;;  %v371_v54 = vld [vmem:[%s2350_s26 + $0x2a8] sm:$0xff] }
  0x24   : > { %1822 = vmatpush3.bf16.msra.mxu0 %v2165_v30  ;;  %v427_v30 = vpack.c.bf16 %v350_v23, %v343_v22  ;;  %v378_v55 = vld [vmem:[%s2350_s26 + $0x2e0] sm:$0xff]  ;;  %v377_v0 = vld [vmem:[%s2350_s26 + $0x2d8] sm:$0xff]  ;;  %v379_v2 = vld [vmem:[%s2350_s26 + $0x2e8] sm:$0xff] }
  0x25   : > { %1886 = vmatpush3.bf16.msra.mxu1 %v2166_v31  ;;  %1935 = vmatprep.subr.bf16.mxu0 %v2167_v44  ;;  %v429_v31 = vpack.c.bf16 %v352_v26, %v345_v25  ;;  %v441_v60 = vpack.c.bf16 %v378_v55, %v371_v54  ;;  %v370_v63 = vld [vmem:[%s2350_s26 + $0x2a0] sm:$0xff]  ;;  %v385_v3 = vld [vmem:[%s2350_s26 + $0x318] sm:$0xff]  ;;  %v392_v4 = vld [vmem:[%s2350_s26 + $0x350] sm:$0xff] }
  0x26   : > { %2110 = vmatprep.subr.bf16.mxu1 %v2167_v44  ;;  %v2180_v44 = vld [vmem:[%s2690_s1 + $0x130] sm:$0xff]   ;;  %v440_v7 = vpack.c.bf16 %v377_v0, %v370_v63  ;;  %v448_v9 = vpack.c.bf16 %v392_v4, %v385_v3  ;;  %v382_v18 = vld [vmem:[%s2350_s26 + $0x300] sm:$0xff]  ;;  %v381_v26 = vld [vmem:[%s2350_s26 + $0x2f8] sm:$0xff] }
  0x27   : > { %911 = vmatmul.mubr.bf16.vlgmr.msra.gmra.mrb[0].mxu0 %v398_v40  ;;  %v359_v40 = vld [vmem:[%s2350_s26 + $0x248] sm:$0xff]  ;;  %v384_v11 = vld [vmem:[%s2350_s26 + $0x310] sm:$0xff]  ;;  %v290_v23 = vld [vmem:[%s2350_s26 + $0x20] sm:$0xff] }
  0x28   : > { %1008 = vmatmul.mubr.bf16.vlgmr.msra.gmra.mrb[0].mxu1 %v400_v43  ;;  %1936 = vmatpush3.bf16.msra.mxu0 %v2168_v45  ;;  %v426_v43 = vpack.c.bf16 %v349_v35, %v342_v34  ;;  %v436_v47 = vpack.c.bf16 %v366_v41, %v359_v40  ;;  %v374_v25 = vld [vmem:[%s2350_s26 + $0x2c0] sm:$0xff]  ;;  %v304_v35 = vld [vmem:[%s2350_s26 + $0x90] sm:$0xff]  ;;  %v395_v38 = vld [vmem:[%s2350_s26 + $0x368] sm:$0xff] }
  0x29   : > { %2118 = vmatpush3.bf16.msra.mxu1 %v2168_v45  ;;  %918 = vmatprep.mubr.bf16.mxu0 %v406_v50  ;;  %v428_v45 = vpack.c.bf16 %v351_v37, %v344_v36  ;;  %v363_v50 = vld [vmem:[%s2350_s26 + $0x268] sm:$0xff]  ;;  %v388_v37 = vld [vmem:[%s2350_s26 + $0x330] sm:$0xff]  ;;  %v326_v40 = vld [vmem:[%s2350_s26 + $0x140] sm:$0xff] }
  0x2a   : > { %1015 = vmatprep.mubr.bf16.mxu1 %v408_v51  ;;  %1937 = vmatprep.subr.bf16.mxu0 %v2169_v57  ;;  %v358_v51 = vld [vmem:[%s2350_s26 + $0x240] sm:$0xff]  ;;  %v311_v36 = vld [vmem:[%s2350_s26 + $0xc8] sm:$0xff]  ;;  %v292_v41 = vld [vmem:[%s2350_s26 + $0x30] sm:$0xff] }
  0x2b   : > { %2111 = vmatprep.subr.bf16.mxu1 %v2169_v57  ;;  %v380_v57 = vld [vmem:[%s2350_s26 + $0x2f0] sm:$0xff]  ;;  %v319_v39 = vld [vmem:[%s2350_s26 + $0x108] sm:$0xff]  ;;  %v354_v0 = vld [vmem:[%s2350_s26 + $0x220] sm:$0xff] }
  0x2c   : > { %1938 = vmatpush3.bf16.msra.mxu0 %v2170_v59  ;;  %v327_v54 = vld [vmem:[%s2350_s26 + $0x148] sm:$0xff] }
  0x2d   : > { %2119 = vmatpush3.bf16.msra.mxu1 %v2170_v59  ;;  %1939 = vmatprep.subr.bf16.mxu0 %v2171_v5  ;;  %v435_v59 = vpack.c.bf16 %v365_v53, %v358_v51  ;;  %v333_v51 = vld [vmem:[%s2350_s26 + $0x178] sm:$0xff]  ;;  %v320_v53 = vld [vmem:[%s2350_s26 + $0x110] sm:$0xff]  ;;  %v347_v63 = vld [vmem:[%s2350_s26 + $0x1e8] sm:$0xff] }
  0x2e   : > { %2112 = vmatprep.subr.bf16.mxu1 %v2171_v5  ;;  %v387_v5 = vld [vmem:[%s2350_s26 + $0x328] sm:$0xff] }
  0x2f   : > { %919 = vmatmul.mubr.bf16.gmra.mrb[4].mxu0 %v405_v56  ;;  %v373_v56 = vld [vmem:[%s2350_s26 + $0x2b8] sm:$0xff] }
  0x30   : > { %1016 = vmatmul.mubr.bf16.gmra.mrb[4].mxu1 %v407_v58  ;;  %926 = vmatprep.mubr.bf16.mxu0 %v413_v62  ;;  %v433_v58 = vpack.c.bf16 %v363_v50, %v356_v48  ;;  %v443_v61 = vpack.c.bf16 %v380_v57, %v373_v56  ;;  %v2183_v62 = vld [vmem:[%s2690_s1 + $0x180] sm:$0xff]   ;;  %v325_v48 = vld [vmem:[%s2350_s26 + $0x138] sm:$0xff] }
  0x31   : > { %1023 = vmatprep.mubr.bf16.mxu1 %v415_v1  ;;  %1940 = vmatpush3.bf16.msra.mxu0 %v2172_v6  ;;  %v372_v1 = vld [vmem:[%s2350_s26 + $0x2b0] sm:$0xff]  ;;  %v313_v50 = vld [vmem:[%s2350_s26 + $0xd8] sm:$0xff] }
  0x32   : > { %2120 = vmatpush3.bf16.msra.mxu1 %v2172_v6  ;;  %1941 = vmatprep.subr.bf16.mxu0 %v2173_v15  ;;  %v394_v6 = vld [vmem:[%s2350_s26 + $0x360] sm:$0xff]  ;;  %v442_v8 = vpack.c.bf16 %v379_v2, %v372_v1  ;;  %v348_v1 = vld [vmem:[%s2350_s26 + $0x1f0] sm:$0xff]  ;;  %v355_v2 = vld [vmem:[%s2350_s26 + $0x228] sm:$0xff] }
  0x33   : > { %2113 = vmatprep.subr.bf16.mxu1 %v2173_v15  ;;  %v450_v10 = vpack.c.bf16 %v394_v6, %v387_v5  ;;  %v291_v15 = vld [vmem:[%s2350_s26 + $0x28] sm:$0xff]  ;;  %v431_v5 = vpack.c.bf16 %v354_v0, %v347_v63  ;;  %v432_v6 = vpack.c.bf16 %v355_v2, %v348_v1 }
  0x35   : > { %1942 = vmatpush3.bf16.msra.mxu0 %v2174_v17 }
  0x36   : > { %2121 = vmatpush3.bf16.msra.mxu1 %v2174_v17  ;;  %1943 = vmatprep.subr.bf16.mxu0 %v2175_v24  ;;  %v375_v17 = vld [vmem:[%s2350_s26 + $0x2c8] sm:$0xff] }
  0x37   : > { %927 = vmatmul.mubr.bf16.gmra.mrb[8].mxu0 %v412_v12  ;;  %2114 = vmatprep.subr.bf16.mxu1 %v2175_v24  ;;  %v391_v12 = vld [vmem:[%s2350_s26 + $0x348] sm:$0xff]  ;;  %v445_v22 = vpack.c.bf16 %v382_v18, %v375_v17  ;;  %v297_v24 = vld [vmem:[%s2350_s26 + $0x58] sm:$0xff] }
  0x38   : > { %1024 = vmatmul.mubr.bf16.gmra.mrb[8].mxu1 %v414_v13  ;;  %934 = vmatprep.mubr.bf16.mxu0 %v420_v14  ;;  %v386_v13 = vld [vmem:[%s2350_s26 + $0x320] sm:$0xff]  ;;  %v393_v14 = vld [vmem:[%s2350_s26 + $0x358] sm:$0xff]  ;;  %v447_v19 = vpack.c.bf16 %v391_v12, %v384_v11  ;;  %v368_v12 = vld [vmem:[%s2350_s26 + $0x290] sm:$0xff] }
  0x39   : > { %1031 = vmatprep.mubr.bf16.mxu1 %v422_v16  ;;  %1944 = vmatpush3.bf16.msra.mxu0 %v2176_v27  ;;  %v298_v16 = vld [vmem:[%s2350_s26 + $0x60] sm:$0xff]  ;;  %v449_v20 = vpack.c.bf16 %v393_v14, %v386_v13  ;;  %v361_v11 = vld [vmem:[%s2350_s26 + $0x258] sm:$0xff]  ;;  %v376_v13 = vld [vmem:[%s2350_s26 + $0x2d0] sm:$0xff] }
  0x3a   : > { %2122 = vmatpush3.bf16.msra.mxu1 %v2176_v27  ;;  %1945 = vmatprep.subr.bf16.mxu0 %v2177_v32  ;;  %v403_v21 = vpack.c.bf16 %v298_v16, %v291_v15  ;;  %v305_v27 = vld [vmem:[%s2350_s26 + $0x98] sm:$0xff]  ;;  %v383_v14 = vld [vmem:[%s2350_s26 + $0x308] sm:$0xff]  ;;  %v438_v17 = vpack.c.bf16 %v368_v12, %v361_v11 }
  0x3b   : > { %2115 = vmatprep.subr.bf16.mxu1 %v2177_v32  ;;  %v444_v32 = vpack.c.bf16 %v381_v26, %v374_v25  ;;  %v446_v18 = vpack.c.bf16 %v383_v14, %v376_v13  ;;  %v2184_v25 = vld [vmem:[%s2692_s3] sm:$0xff]   ;;  %v2185_v26 = vld [vmem:[%s2692_s3 + $0x8] sm:$0xff]  }
  0x3d   : > { %1946 = vmatpush3.bf16.msra.mxu0 %v2178_v33 }
  0x3e   : > { %2123 = vmatpush3.bf16.msra.mxu1 %v2178_v33  ;;  %1947 = vmatprep.subr.bf16.mxu0 %v2179_v42 }
  0x3f   : > { %935 = vmatmul.mubr.bf16.gmra.mrb[12].mxu0 %v419_v28  ;;  %2116 = vmatprep.subr.bf16.mxu1 %v2179_v42  ;;  %v312_v28 = vld [vmem:[%s2350_s26 + $0xd0] sm:$0xff]  ;;  %v299_v42 = vld [vmem:[%s2350_s26 + $0x68] sm:$0xff] }
  0x40   : > { %1032 = vmatmul.mubr.bf16.gmra.mrb[12].mxu1 %v421_v29  ;;  %942 = vmatprep.mubr.bf16.mxu0 %v427_v30  ;;  %v389_v29 = vld [vmem:[%s2350_s26 + $0x338] sm:$0xff]  ;;  %v396_v30 = vld [vmem:[%s2350_s26 + $0x370] sm:$0xff]  ;;  %v410_v33 = vpack.c.bf16 %v312_v28, %v305_v27 }
  0x41   : > { %1039 = vmatprep.mubr.bf16.mxu1 %v429_v31  ;;  %1948 = vmatpush3.bf16.msra.mxu0 %v2180_v44  ;;  %v402_v31 = vpack.c.bf16 %v297_v24, %v290_v23  ;;  %v452_v34 = vpack.c.bf16 %v396_v30, %v389_v29  ;;  %v2186_v27 = vld [vmem:[%s2692_s3 + $0x10] sm:$0xff]   ;;  %v2187_v28 = vld [vmem:[%s2692_s3 + $0x18] sm:$0xff]   ;;  %v2188_v29 = vld [vmem:[%s2692_s3 + $0x20] sm:$0xff]  }
  0x42   : > { %2124 = vmatpush3.bf16.msra.mxu1 %v2180_v44  ;;  %1949 = vmatprep.subr.bf16.mxu0 %v2181_v49  ;;  %v451_v44 = vpack.c.bf16 %v395_v38, %v388_v37  ;;  %v2189_v30 = vld [vmem:[%s2692_s3 + $0x28] sm:$0xff]  }
  0x43   : > { %2117 = vmatprep.subr.bf16.mxu1 %v2181_v49  ;;  %v306_v49 = vld [vmem:[%s2350_s26 + $0xa0] sm:$0xff] }
  0x44   : > { %v411_v56 = vpack.c.bf16 %v313_v50, %v306_v49 }
  0x45   : > { %1950 = vmatpush3.bf16.msra.mxu0 %v2182_v52 }
  0x46   : > { %2125 = vmatpush3.bf16.msra.mxu1 %v2182_v52  ;;  %v340_v52 = vld [vmem:[%s2350_s26 + $0x1b0] sm:$0xff] }
  0x47   : > { %943 = vmatmul.mubr.bf16.gmra.mrb[16].mxu0 %v426_v43  ;;  %2036 = vmatprep.subr.bf16.mxu1 %v2183_v62  ;;  %v409_v43 = vpack.c.bf16 %v311_v36, %v304_v35  ;;  %v424_v57 = vpack.c.bf16 %v340_v52, %v333_v51  ;;  %v2562_v36 = vld [vmem:[%s2691_s2] ss:$0 sm:$0xff] }
  0x48   : > { %1040 = vmatmul.mubr.bf16.gmra.mrb[16].mxu1 %v428_v45  ;;  %950 = vmatprep.mubr.bf16.mxu0 %v434_v46  ;;  %v417_v45 = vpack.c.bf16 %v326_v40, %v319_v39  ;;  %v404_v46 = vpack.c.bf16 %v299_v42, %v292_v41 }
  0x49   : > { %1047 = vmatprep.mubr.bf16.mxu1 %v436_v47  ;;  %v318_v47 = vld [vmem:[%s2350_s26 + $0x100] sm:$0xff] }
  0x4a   : > { %v416_v55 = vpack.c.bf16 %v325_v48, %v318_v47 }
  0x4f   : > { %951 = vmatmul.mubr.bf16.gmra.mrb[20].mxu0 %v433_v58  ;;  %v418_v58 = vpack.c.bf16 %v327_v54, %v320_v53 }
  0x50   : > { %1048 = vmatmul.mubr.bf16.gmra.mrb[20].mxu1 %v435_v59  ;;  %958 = vmatprep.mubr.bf16.mxu0 %v441_v60  ;;  %v332_v59 = vld [vmem:[%s2350_s26 + $0x170] sm:$0xff]  ;;  %v339_v60 = vld [vmem:[%s2350_s26 + $0x1a8] sm:$0xff] }
  0x51   : > { %1055 = vmatprep.mubr.bf16.mxu1 %v443_v61  ;;  %v334_v61 = vld [vmem:[%s2350_s26 + $0x180] sm:$0xff]  ;;  %v423_v3 = vpack.c.bf16 %v339_v60, %v332_v59 }
  0x57   : > { %959 = vmatmul.mubr.bf16.gmra.mrb[24].mxu0 %v440_v7  ;;  %v346_v7 = vld [vmem:[%s2350_s26 + $0x1e0] sm:$0xff] }
  0x58   : > { %1056 = vmatmul.mubr.bf16.gmra.mrb[24].mxu1 %v442_v8  ;;  %966 = vmatprep.mubr.bf16.mxu0 %v448_v9  ;;  %v353_v8 = vld [vmem:[%s2350_s26 + $0x218] sm:$0xff]  ;;  %v362_v9 = vld [vmem:[%s2350_s26 + $0x260] sm:$0xff] }
  0x59   : > { %1063 = vmatprep.mubr.bf16.mxu1 %v450_v10  ;;  %v369_v10 = vld [vmem:[%s2350_s26 + $0x298] sm:$0xff]  ;;  %v430_v15 = vpack.c.bf16 %v353_v8, %v346_v7 }
  0x5a   : > { %v439_v16 = vpack.c.bf16 %v369_v10, %v362_v9 }
  0x5f   : > { %967 = vmatmul.mubr.bf16.gmra.mrb[28].mxu0 %v447_v19  ;;  %v360_v19 = vld [vmem:[%s2350_s26 + $0x250] sm:$0xff] }
  0x60   : > { %1064 = vmatmul.mubr.bf16.gmra.mrb[28].mxu1 %v449_v20  ;;  %1104 = vmatprep.mubr.bf16.mxu0 %v403_v21  ;;  %v367_v20 = vld [vmem:[%s2350_s26 + $0x288] sm:$0xff]  ;;  %v390_v21 = vld [vmem:[%s2350_s26 + $0x340] sm:$0xff] }
  0x61   : > { %1152 = vmatprep.mubr.bf16.mxu1 %v445_v22  ;;  %v397_v22 = vld [vmem:[%s2350_s26 + $0x378] sm:$0xff]  ;;  %v437_v23 = vpack.c.bf16 %v367_v20, %v360_v19 }
  0x62   : > { %v453_v24 = vpack.c.bf16 %v397_v22, %v390_v21 }
  0x67   : > { %1105 = vmatmul.mubr.bf16.vlgmr.msra.gmra.mrb[32].mxu0 %v402_v31  ;;  %v2190_v31 = vld [vmem:[%s2692_s3 + $0x30] sm:$0xff]  }
  0x68   : > { %1153 = vmatmul.mubr.bf16.vlgmr.msra.gmra.mrb[32].mxu1 %v444_v32  ;;  %1112 = vmatprep.mubr.bf16.mxu0 %v410_v33  ;;  %v2191_v32 = vld [vmem:[%s2692_s3 + $0x38] sm:$0xff]   ;;  %v2192_v33 = vld [vmem:[%s2694_s5] sm:$0xff]  }
  0x69   : > { %1160 = vmatprep.mubr.bf16.mxu1 %v452_v34  ;;  %2037 = vmatpush3.bf16.msra.mxu1 %v2183_v62  ;;  %v341_v62 = vld [vmem:[%s2350_s26 + $0x1b8] sm:$0xff]  ;;  %v2193_v34 = vld [vmem:[%s2694_s5 + $0x8] sm:$0xff]  }
  0x6a   : > { %v425_v4 = vpack.c.bf16 %v341_v62, %v334_v61  ;;  %2054 = vmatprep.subr.bf16.mxu1 %v2184_v25  ;;  %2086 = vmatprep.subr.bf16.mxu0 %v2192_v33 }
  0x6b   : > { %2087 = vmatpush3.bf16.msra.mxu0 %v2192_v33 }
  0x6c   : > { %2088 = vmatprep.subr.bf16.mxu0 %v2193_v34 }
  0x6f   : > { %1113 = vmatmul.mubr.bf16.gmra.mrb[36].mxu0 %v409_v43 }
  0x70   : > { %1161 = vmatmul.mubr.bf16.gmra.mrb[36].mxu1 %v451_v44  ;;  %1120 = vmatprep.mubr.bf16.mxu0 %v417_v45  ;;  %v2194_v45 = vld [vmem:[%s2694_s5 + $0x10] sm:$0xff]  }
  0x71   : > { %2038 = vmatprep.mubr.msk.bf16.mxu1 %vm853_vm0, %v404_v46  ;;  %2089 = vmatpush3.bf16.msra.mxu0 %v2193_v34 }
  0x72   : > { %2090 = vmatprep.subr.bf16.mxu0 %v2194_v45 }
  0x75   : > { %2091 = vmatpush3.bf16.msra.mxu0 %v2194_v45 }
  0x77   : > { %1121 = vmatmul.mubr.bf16.gmra.mrb[40].mxu0 %v416_v55 }
  0x78   : > { %2039 = vmatmul.mubr.msk.bf16.vlgmr.msra.gmra.mrb[40].mxu1 %vm853_vm0, %v411_v56  ;;  %1128 = vmatprep.mubr.bf16.mxu0 %v424_v57 }
  0x79   : > { %2042 = vmatprep.mubr.msk.bf16.mxu1 %vm853_vm0, %v418_v58  ;;  %2055 = vmatpush3.bf16.msra.mxu1 %v2184_v25 }
  0x7a   : > { %2056 = vmatprep.subr.bf16.mxu1 %v2185_v26 }
  0x7d   : > { %2057 = vmatpush3.bf16.msra.mxu1 %v2185_v26 }
  0x7e   : > { %2058 = vmatprep.subr.bf16.mxu1 %v2186_v27 }
  0x7f   : > { %1129 = vmatmul.mubr.bf16.gmra.mrb[44].mxu0 %v423_v3 }
  0x80   : > { %2043 = vmatmul.mubr.msk.bf16.gmra.mrb[44].mxu1 %vm853_vm0, %v425_v4  ;;  %1136 = vmatprep.mubr.bf16.mxu0 %v431_v5 }
  0x81   : > { %2046 = vmatprep.mubr.msk.bf16.mxu1 %vm853_vm0, %v432_v6  ;;  %2059 = vmatpush3.bf16.msra.mxu1 %v2186_v27 }
  0x82   : > { %2060 = vmatprep.subr.bf16.mxu1 %v2187_v28 }
  0x85   : > { %2061 = vmatpush3.bf16.msra.mxu1 %v2187_v28 }
  0x86   : > { %2062 = vmatprep.subr.bf16.mxu1 %v2188_v29 }
  0x87   : > { %1137 = vmatmul.mubr.bf16.gmra.mrb[48].mxu0 %v430_v15 }
  0x88   : > { %2047 = vmatmul.mubr.msk.bf16.gmra.mrb[48].mxu1 %vm853_vm0, %v439_v16  ;;  %1144 = vmatprep.mubr.bf16.mxu0 %v438_v17 }
  0x89   : > { %2050 = vmatprep.mubr.msk.bf16.mxu1 %vm853_vm0, %v446_v18  ;;  %2063 = vmatpush3.bf16.msra.mxu1 %v2188_v29 }
  0x8a   : > { %2064 = vmatprep.subr.bf16.mxu1 %v2189_v30 }
  0x8d   : > { %2065 = vmatpush3.bf16.msra.mxu1 %v2189_v30 }
  0x8e   : > { %2066 = vmatprep.subr.bf16.mxu1 %v2190_v31 }
  0x8f   : > { %1145 = vmatmul.mubr.bf16.gmra.mrb[52].mxu0 %v437_v23 }
  0x90   : > { %2051 = vmatmul.mubr.msk.bf16.gmra.mrb[52].mxu1 %vm853_vm0, %v453_v24 }
  0x91   : > { %2067 = vmatpush3.bf16.msra.mxu1 %v2190_v31 }
  0x92   : > { %2068 = vmatprep.subr.bf16.mxu1 %v2191_v32 }
  0x95   : > { %2069 = vmatpush3.bf16.msra.mxu1 %v2191_v32 }
  0xfa   : > { %v1823_v35 = vpop.f32.mrb[0].mxu0 }
  0xfb   : > { %v1824_v37 = vpop.f32.mrb[1].mxu0  ;;  %v1887_v38 = vpop.f32.mrb[0].mxu1 }
  0xfc   : > { %v1825_v39 = vadd.f32 %v1824_v37, %v1823_v35  ;;  %v1826_v40 = vpop.f32.mrb[2].mxu0  ;;  %v1888_v41 = vpop.f32.mrb[1].mxu1 }
  0xfd   : > { %v1827_v42 = vpop.f32.mrb[3].mxu0  ;;  %v1889_v43 = vadd.f32 %v1888_v41, %v1887_v38  ;;  %v1890_v44 = vpop.f32.mrb[2].mxu1 }
  0xfe   : > { %v913_v46 = vadd.f32 %v1825_v39, %v2562_v36  ;;  %v1828_v47 = vadd.f32 %v1827_v42, %v1826_v40  ;;  %v1891_v48 = vpop.f32.mrb[3].mxu1 }
  0xff   : > { %v1892_v49 = vadd.f32 %v1891_v48, %v1890_v44 }
 0x100   : > { %v916_v50 = vadd.f32 %v1828_v47, %v2562_v36  ;;  %v2569_v51 = vadd.f32 %v1889_v43, %v913_v46 }
 0x102   : > { %v2571_v52 = vadd.f32 %v1892_v49, %v916_v50  ;;  %v1829_v53 = vpop.f32.mrb[4].mxu0 }
 0x103   : > { %v1830_v54 = vpop.f32.mrb[5].mxu0  ;;  %v1893_v55 = vpop.f32.mrb[4].mxu1 }
 0x104   : > { %v1831_v56 = vadd.f32 %v1830_v54, %v1829_v53  ;;  %v1832_v57 = vpop.f32.mrb[6].mxu0  ;;  %v1894_v58 = vpop.f32.mrb[5].mxu1 }
 0x105   : > { %v1833_v59 = vpop.f32.mrb[7].mxu0  ;;  %v1895_v60 = vadd.f32 %v1894_v58, %v1893_v55  ;;  %v1896_v61 = vpop.f32.mrb[6].mxu1 }
 0x106   : > { %v921_v62 = vadd.f32 %v1831_v56, %v2562_v36  ;;  %v1834_v63 = vadd.f32 %v1833_v59, %v1832_v57  ;;  %v1897_v0 = vpop.f32.mrb[7].mxu1 }
 0x107   : > { %v1898_v1 = vadd.f32 %v1897_v0, %v1896_v61 }
 0x108   : > { %v924_v2 = vadd.f32 %v1834_v63, %v2562_v36  ;;  %v2575_v3 = vadd.f32 %v1895_v60, %v921_v62 }
 0x10a   : > { %v2577_v4 = vadd.f32 %v1898_v1, %v924_v2  ;;  %v1835_v5 = vpop.f32.mrb[8].mxu0 }
 0x10b   : > { %v1836_v6 = vpop.f32.mrb[9].mxu0  ;;  %v1899_v7 = vpop.f32.mrb[8].mxu1 }
 0x10c   : > { %v1837_v8 = vadd.f32 %v1836_v6, %v1835_v5  ;;  %v1838_v9 = vpop.f32.mrb[10].mxu0  ;;  %v1900_v10 = vpop.f32.mrb[9].mxu1 }
 0x10d   : > { %v1839_v11 = vpop.f32.mrb[11].mxu0  ;;  %v1901_v12 = vadd.f32 %v1900_v10, %v1899_v7  ;;  %v1902_v13 = vpop.f32.mrb[10].mxu1 }
 0x10e   : > { %v929_v14 = vadd.f32 %v1837_v8, %v2562_v36  ;;  %v1840_v15 = vadd.f32 %v1839_v11, %v1838_v9  ;;  %v1903_v16 = vpop.f32.mrb[11].mxu1 }
 0x10f   : > { %v1904_v17 = vadd.f32 %v1903_v16, %v1902_v13 }
 0x110   : > { %v932_v18 = vadd.f32 %v1840_v15, %v2562_v36  ;;  %v2581_v19 = vadd.f32 %v1901_v12, %v929_v14 }
 0x112   : > { %v2583_v20 = vadd.f32 %v1904_v17, %v932_v18  ;;  %v1841_v21 = vpop.f32.mrb[12].mxu0 }
 0x113   : > { %v1842_v22 = vpop.f32.mrb[13].mxu0  ;;  %v1905_v23 = vpop.f32.mrb[12].mxu1 }
 0x114   : > { %v1843_v24 = vadd.f32 %v1842_v22, %v1841_v21  ;;  %v1844_v25 = vpop.f32.mrb[14].mxu0  ;;  %v1906_v26 = vpop.f32.mrb[13].mxu1 }
 0x115   : > { %v1845_v27 = vpop.f32.mrb[15].mxu0  ;;  %v1907_v28 = vadd.f32 %v1906_v26, %v1905_v23  ;;  %v1908_v29 = vpop.f32.mrb[14].mxu1 }
 0x116   : > { %v937_v30 = vadd.f32 %v1843_v24, %v2562_v36  ;;  %v1846_v31 = vadd.f32 %v1845_v27, %v1844_v25  ;;  %v1909_v32 = vpop.f32.mrb[15].mxu1 }
 0x117   : > { %v1910_v33 = vadd.f32 %v1909_v32, %v1908_v29 }
 0x118   : > { %v940_v34 = vadd.f32 %v1846_v31, %v2562_v36  ;;  %v2587_v35 = vadd.f32 %v1907_v28, %v937_v30 }
 0x11a   : > { %v2589_v37 = vadd.f32 %v1910_v33, %v940_v34  ;;  %v1847_v38 = vpop.f32.mrb[16].mxu0 }
 0x11b   : > { %v1848_v39 = vpop.f32.mrb[17].mxu0  ;;  %v1911_v40 = vpop.f32.mrb[16].mxu1 }
 0x11c   : > { %v1849_v41 = vadd.f32 %v1848_v39, %v1847_v38  ;;  %v1850_v42 = vpop.f32.mrb[18].mxu0  ;;  %v1912_v43 = vpop.f32.mrb[17].mxu1 }
 0x11d   : > { %v1851_v44 = vpop.f32.mrb[19].mxu0  ;;  %v1913_v45 = vadd.f32 %v1912_v43, %v1911_v40  ;;  %v1914_v46 = vpop.f32.mrb[18].mxu1 }
 0x11e   : > { %v945_v47 = vadd.f32 %v1849_v41, %v2562_v36  ;;  %v1852_v48 = vadd.f32 %v1851_v44, %v1850_v42  ;;  %v1915_v49 = vpop.f32.mrb[19].mxu1 }
 0x11f   : > { %v1916_v50 = vadd.f32 %v1915_v49, %v1914_v46 }
 0x120   : > { %v948_v53 = vadd.f32 %v1852_v48, %v2562_v36  ;;  %v2593_v54 = vadd.f32 %v1913_v45, %v945_v47 }
 0x122   : > { %v2595_v55 = vadd.f32 %v1916_v50, %v948_v53  ;;  %v1853_v56 = vpop.f32.mrb[20].mxu0 }
 0x123   : > { %v1854_v57 = vpop.f32.mrb[21].mxu0  ;;  %v1917_v58 = vpop.f32.mrb[20].mxu1 }
 0x124   : > { %v1855_v59 = vadd.f32 %v1854_v57, %v1853_v56  ;;  %v1856_v60 = vpop.f32.mrb[22].mxu0  ;;  %v1918_v61 = vpop.f32.mrb[21].mxu1 }
 0x125   : > { %v1857_v62 = vpop.f32.mrb[23].mxu0  ;;  %v1919_v63 = vadd.f32 %v1918_v61, %v1917_v58  ;;  %v1920_v0 = vpop.f32.mrb[22].mxu1 }
 0x126   : > { %v953_v1 = vadd.f32 %v1855_v59, %v2562_v36  ;;  %v1858_v2 = vadd.f32 %v1857_v62, %v1856_v60  ;;  %v1921_v5 = vpop.f32.mrb[23].mxu1 }
 0x127   : > { %v1922_v6 = vadd.f32 %v1921_v5, %v1920_v0 }
 0x128   : > { %v956_v7 = vadd.f32 %v1858_v2, %v2562_v36  ;;  %v2599_v8 = vadd.f32 %v1919_v63, %v953_v1 }
 0x12a   : > { %v2601_v9 = vadd.f32 %v1922_v6, %v956_v7  ;;  %v1859_v10 = vpop.f32.mrb[24].mxu0 }
 0x12b   : > { %v1860_v11 = vpop.f32.mrb[25].mxu0  ;;  %v1923_v12 = vpop.f32.mrb[24].mxu1 }
 0x12c   : > { %v1861_v13 = vadd.f32 %v1860_v11, %v1859_v10  ;;  %v1862_v14 = vpop.f32.mrb[26].mxu0  ;;  %v1924_v15 = vpop.f32.mrb[25].mxu1 }
 0x12d   : > { %v1863_v16 = vpop.f32.mrb[27].mxu0  ;;  %v1925_v17 = vadd.f32 %v1924_v15, %v1923_v12  ;;  %v1926_v18 = vpop.f32.mrb[26].mxu1 }
 0x12e   : > { %v961_v21 = vadd.f32 %v1861_v13, %v2562_v36  ;;  %v1864_v22 = vadd.f32 %v1863_v16, %v1862_v14  ;;  %v1927_v23 = vpop.f32.mrb[27].mxu1 }
 0x12f   : > { %v1928_v24 = vadd.f32 %v1927_v23, %v1926_v18 }
 0x130   : > { %v964_v25 = vadd.f32 %v1864_v22, %v2562_v36  ;;  %v1058_v26 = vadd.f32 %v1925_v17, %v961_v21 }
 0x132   : > { %v1061_v27 = vadd.f32 %v1928_v24, %v964_v25  ;;  %v1865_v28 = vpop.f32.mrb[28].mxu0 }
 0x133   : > { %v1866_v29 = vpop.f32.mrb[29].mxu0  ;;  %v1929_v30 = vpop.f32.mrb[28].mxu1 }
 0x134   : > { %v1867_v31 = vadd.f32 %v1866_v29, %v1865_v28  ;;  %v1868_v32 = vpop.f32.mrb[30].mxu0  ;;  %v1930_v33 = vpop.f32.mrb[29].mxu1 }
 0x135   : > { %v1869_v34 = vpop.f32.mrb[31].mxu0  ;;  %v1931_v38 = vadd.f32 %v1930_v33, %v1929_v30  ;;  %v1932_v39 = vpop.f32.mrb[30].mxu1 }
 0x136   : > { %v969_v40 = vadd.f32 %v1867_v31, %v2562_v36  ;;  %v1870_v41 = vadd.f32 %v1869_v34, %v1868_v32  ;;  %v1933_v42 = vpop.f32.mrb[31].mxu1 }
 0x137   : > { %v1934_v43 = vadd.f32 %v1933_v42, %v1932_v39 }
 0x138   : > { %v972_v44 = vadd.f32 %v1870_v41, %v2562_v36  ;;  %v1066_v45 = vadd.f32 %v1931_v38, %v969_v40 }
 0x13a   : > { %v1069_v46 = vadd.f32 %v1934_v43, %v972_v44  ;;  %v1951_v47 = vpop.f32.mrb[32].mxu0 }
 0x13b   : > { %v1987_v48 = vpop.f32.mrb[32].mxu1  ;;  %v1952_v49 = vpop.f32.mrb[33].mxu0 }
 0x13c   : > { %v1953_v50 = vadd.f32 %v1952_v49, %v1951_v47  ;;  %v1988_v53 = vpop.f32.mrb[33].mxu1  ;;  %v1954_v56 = vpop.f32.mrb[34].mxu0 }
 0x13d   : > { %v1989_v57 = vadd.f32 %v1988_v53, %v1987_v48  ;;  %v1990_v58 = vpop.f32.mrb[34].mxu1  ;;  %v1955_v59 = vpop.f32.mrb[35].mxu0 }
 0x13e   : > { %v1956_v60 = vadd.f32 %v1955_v59, %v1954_v56  ;;  %v1991_v61 = vpop.f32.mrb[35].mxu1  ;;  %v1107_v62 = vadd.f32 %v1953_v50, %v2569_v51 }
 0x13f   : > { %v1992_v63 = vadd.f32 %v1991_v61, %v1990_v58  ;;  %v2608_v0 = vadd.f32 %v1989_v57, %v1058_v26 }
 0x140   : > { %v1110_v36 = vadd.f32 %v1956_v60, %v2571_v52 }
 0x141   : > { %v2611_v1 = vadd.f32 %v1992_v63, %v1061_v27 }
 0x142   : > { %v1957_v2 = vpop.f32.mrb[36].mxu0 }
 0x143   : > { %v1993_v5 = vpop.f32.mrb[36].mxu1  ;;  %v1958_v6 = vpop.f32.mrb[37].mxu0 }
 0x144   : > { %v1959_v7 = vadd.f32 %v1958_v6, %v1957_v2  ;;  %v1994_v10 = vpop.f32.mrb[37].mxu1  ;;  %v1960_v11 = vpop.f32.mrb[38].mxu0 }
 0x145   : > { %v1995_v12 = vadd.f32 %v1994_v10, %v1993_v5  ;;  %v1996_v13 = vpop.f32.mrb[38].mxu1  ;;  %v1961_v14 = vpop.f32.mrb[39].mxu0 }
 0x146   : > { %v1962_v15 = vadd.f32 %v1961_v14, %v1960_v11  ;;  %v1997_v16 = vpop.f32.mrb[39].mxu1  ;;  %v1115_v51 = vadd.f32 %v1959_v7, %v2575_v3 }
 0x147   : > { %v1998_v17 = vadd.f32 %v1997_v16, %v1996_v13  ;;  %v2614_v18 = vadd.f32 %v1995_v12, %v1066_v45 }
 0x148   : > { %v1118_v52 = vadd.f32 %v1962_v15, %v2577_v4 }
 0x149   : > { %v2617_v21 = vadd.f32 %v1998_v17, %v1069_v46 }
 0x14a   : > { %v1963_v22 = vpop.f32.mrb[40].mxu0 }
 0x14b   : > { %v2040_v23 = vpop.f32.mrb[40].mxu1  ;;  %v1964_v24 = vpop.f32.mrb[41].mxu0 }
 0x14c   : > { %v1212_v25 = vadd.f32 %v2040_v23, %v1115_v51  ;;  %v1965_v26 = vadd.f32 %v1964_v24, %v1963_v22  ;;  %v1203_v27 = vpop.f32.mrb[41].mxu1  ;;  %v1966_v28 = vpop.f32.mrb[42].mxu0 }
 0x14d   : > { %v1204_v29 = vadd.f32 %v1203_v27, %v1107_v62  ;;  %v2041_v30 = vpop.f32.mrb[42].mxu1  ;;  %v1967_v31 = vpop.f32.mrb[43].mxu0 }
 0x14e   : > { %v1215_v32 = vadd.f32 %v2041_v30, %v1118_v52  ;;  %v1968_v33 = vadd.f32 %v1967_v31, %v1966_v28  ;;  %v1206_v3 = vpop.f32.mrb[43].mxu1  ;;  %v1123_v34 = vadd.f32 %v1965_v26, %v2581_v19  ;;  %v1268_v39 = vmax.f32 %v1212_v25, 0.0 }
 0x14f   : > { %v1207_v38 = vadd.f32 %v1206_v3, %v1110_v36  ;;  %v1266_v41 = vmax.f32 %v1204_v29, 0.0 }
 0x150   : > { %v1269_v4 = vmax.f32 %v1215_v32, 0.0  ;;  %v1126_v40 = vadd.f32 %v1968_v33, %v2583_v20 }
 0x151   : > { %v1267_v42 = vmax.f32 %v1207_v38, 0.0 }
 0x152   : > { %v1283_v43 = vpack.c.bf16 %v1269_v4, %v1268_v39  ;;  %v1969_v44 = vpop.f32.mrb[44].mxu0 }
 0x153   : > { %v1282_v45 = vpack.c.bf16 %v1267_v42, %v1266_v41  ;;  %v2044_v46 = vpop.f32.mrb[44].mxu1  ;;  %v1970_v47 = vpop.f32.mrb[45].mxu0 }
 0x154   : > { %v1971_v48 = vadd.f32 %v1970_v47, %v1969_v44  ;;  %v1219_v49 = vpop.f32.mrb[45].mxu1  ;;  %v1972_v50 = vpop.f32.mrb[46].mxu0 }
 0x155   : > { %v1220_v53 = vadd.f32 %v1219_v49, %v1123_v34  ;;  %v2045_v56 = vpop.f32.mrb[46].mxu1  ;;  %2070 = vmatprep.mubr.bf16.mxu1 %v1282_v45  ;;  %v1973_v57 = vpop.f32.mrb[47].mxu0 }
 0x156   : > { %v1131_v19 = vadd.f32 %v1971_v48, %v2587_v35  ;;  %v1974_v58 = vadd.f32 %v1973_v57, %v1972_v50  ;;  %v1222_v59 = vpop.f32.mrb[47].mxu1  ;;  %2071 = vmatmul.mubr.bf16.vlgmr.msra.gmra.mrb[56].mxu1 %v1283_v43 }
 0x157   : > { %v1223_v20 = vadd.f32 %v1222_v59, %v1126_v40  ;;  %v1270_v62 = vmax.f32 %v1220_v53, 0.0 }
 0x158   : > { %v1228_v60 = vadd.f32 %v2044_v46, %v1131_v19  ;;  %v1134_v61 = vadd.f32 %v1974_v58, %v2589_v37 }
 0x159   : > { %v1271_v63 = vmax.f32 %v1223_v20, 0.0 }
 0x15a   : > { %v1231_v36 = vadd.f32 %v2045_v56, %v1134_v61  ;;  %v1975_v2 = vpop.f32.mrb[48].mxu0  ;;  %v1272_v10 = vmax.f32 %v1228_v60, 0.0 }
 0x15b   : > { %v1284_v5 = vpack.c.bf16 %v1271_v63, %v1270_v62  ;;  %v1976_v6 = vpop.f32.mrb[49].mxu0  ;;  %v2048_v7 = vpop.f32.mrb[48].mxu1 }
 0x15c   : > { %v1273_v11 = vmax.f32 %v1231_v36, 0.0  ;;  %v1977_v12 = vadd.f32 %v1976_v6, %v1975_v2  ;;  %v1978_v13 = vpop.f32.mrb[50].mxu0  ;;  %v1235_v14 = vpop.f32.mrb[49].mxu1 }
 0x15d   : > { %2074 = vmatprep.mubr.bf16.mxu1 %v1284_v5  ;;  %v1979_v35 = vpop.f32.mrb[51].mxu0  ;;  %v2049_v15 = vpop.f32.mrb[50].mxu1 }
 0x15e   : > { %v1980_v16 = vadd.f32 %v1979_v35, %v1978_v13  ;;  %v1139_v51 = vadd.f32 %v1977_v12, %v2593_v54  ;;  %v1285_v17 = vpack.c.bf16 %v1273_v11, %v1272_v10  ;;  %v1238_v37 = vpop.f32.mrb[51].mxu1 }
 0x160   : > { %v1236_v52 = vadd.f32 %v1235_v14, %v1139_v51  ;;  %2075 = vmatmul.mubr.bf16.gmra.mrb[60].mxu1 %v1285_v17  ;;  %v1142_v22 = vadd.f32 %v1980_v16, %v2595_v55 }
 0x162   : > { %v1239_v23 = vadd.f32 %v1238_v37, %v1142_v22  ;;  %v1981_v24 = vpop.f32.mrb[52].mxu0  ;;  %v1274_v27 = vmax.f32 %v1236_v52, 0.0 }
 0x163   : > { %v2052_v25 = vpop.f32.mrb[52].mxu1  ;;  %v1982_v26 = vpop.f32.mrb[53].mxu0 }
 0x164   : > { %v1275_v28 = vmax.f32 %v1239_v23, 0.0  ;;  %v1260_v29 = vadd.f32 %v2052_v25, %v2614_v18  ;;  %v1983_v30 = vadd.f32 %v1982_v26, %v1981_v24  ;;  %v1251_v31 = vpop.f32.mrb[53].mxu1  ;;  %v1984_v32 = vpop.f32.mrb[54].mxu0 }
 0x165   : > { %v1252_v33 = vadd.f32 %v1251_v31, %v2608_v0  ;;  %v2053_v54 = vpop.f32.mrb[54].mxu1  ;;  %v1985_v3 = vpop.f32.mrb[55].mxu0 }
 0x166   : > { %v1286_v34 = vpack.c.bf16 %v1275_v28, %v1274_v27  ;;  %v1147_v38 = vadd.f32 %v1983_v30, %v2599_v8  ;;  %v1263_v55 = vadd.f32 %v2053_v54, %v2617_v21  ;;  %v1254_v39 = vpop.f32.mrb[55].mxu1  ;;  %v1986_v4 = vadd.f32 %v1985_v3, %v1984_v32 }
 0x167   : > { %v1255_v40 = vadd.f32 %v1254_v39, %v2611_v1  ;;  %v1280_v41 = vmax.f32 %v1260_v29, 0.0  ;;  %v1278_v18 = vmax.f32 %v1252_v33, 0.0  ;;  %v2195_v1 = vld [vmem:[%s2694_s5 + $0x18] sm:$0xff]  }
 0x168   : > { %v1244_v42 = vadd.f32 %v2048_v7, %v1147_v38  ;;  %v1281_v43 = vmax.f32 %v1263_v55, 0.0  ;;  %2078 = vmatprep.mubr.bf16.mxu1 %v1286_v34  ;;  %v1150_v44 = vadd.f32 %v1986_v4, %v2601_v9  ;;  %2092 = vmatprep.subr.bf16.mxu0 %v2195_v1  ;;  %v1783_v9 = vld [vmem:[%s2693_s4] ss:$0 sm:$0xff] }
 0x169   : > { %v1279_v45 = vmax.f32 %v1255_v40, 0.0  ;;  %2093 = vmatpush3.bf16.msra.mxu0 %v2195_v1 }
 0x16a   : > { %v1289_v0 = vpack.c.bf16 %v1281_v43, %v1280_v41  ;;  %v1247_v46 = vadd.f32 %v2049_v15, %v1150_v44  ;;  %v1276_v48 = vmax.f32 %v1244_v42, 0.0 }
 0x16b   : > { %v1288_v47 = vpack.c.bf16 %v1279_v45, %v1278_v18 }
 0x16c   : > { %v1277_v49 = vmax.f32 %v1247_v46, 0.0 }
 0x16e   : > { %v1287_v8 = vpack.c.bf16 %v1277_v49, %v1276_v48 }
 0x170   : > { %2079 = vmatmul.mubr.bf16.gmra.mrb[64].mxu1 %v1287_v8 }
 0x171   : > { %2082 = vmatprep.mubr.bf16.mxu1 %v1288_v47 }
 0x178   : > { %2083 = vmatmul.mubr.bf16.gmra.mrb[68].mxu1 %v1289_v0  ;;  %v1792_v0 = vld [vmem:[%s2695_s6] ss:$0 sm:$0xff] }
 0x229   : > { %v2072_v21 = vpop.f32.mrb[56].mxu1 }
 0x22a   : > { %v1404_v50 = vadd.f32 %v2072_v21, %v1783_v9  ;;  %v1395_v53 = vpop.f32.mrb[57].mxu1 }
 0x22b   : > { %v1396_v56 = vadd.f32 %v1783_v9, %v1395_v53  ;;  %v2073_v57 = vpop.f32.mrb[58].mxu1 }
 0x22c   : > { %v1407_v19 = vadd.f32 %v2073_v57, %v1783_v9  ;;  %v1398_v58 = vpop.f32.mrb[59].mxu1  ;;  %v1460_v20 = vmax.f32 %v1404_v50, 0.0 }
 0x22d   : > { %v1399_v59 = vadd.f32 %v1783_v9, %v1398_v58  ;;  %v1458_v61 = vmax.f32 %v1396_v56, 0.0 }
 0x22e   : > { %v1461_v60 = vmax.f32 %v1407_v19, 0.0 }
 0x22f   : > { %v1459_v62 = vmax.f32 %v1399_v59, 0.0 }
 0x230   : > { %v1475_v63 = vpack.c.bf16 %v1461_v60, %v1460_v20 }
 0x231   : > { %v1474_v36 = vpack.c.bf16 %v1459_v62, %v1458_v61 }
 0x233   : > { %2094 = vmatprep.mubr.msk.bf16.mxu0 %vm1521_vm1, %v1474_v36  ;;  %v2076_v2 = vpop.f32.mrb[60].mxu1 }
 0x234   : > { %v1420_v5 = vadd.f32 %v2076_v2, %v1783_v9  ;;  %2095 = vmatmul.mubr.msk.bf16.vlgmr.msra.gmra.mrb[56].mxu0 %vm1521_vm1, %v1475_v63  ;;  %v1411_v6 = vpop.f32.mrb[61].mxu1 }
 0x235   : > { %v1412_v7 = vadd.f32 %v1783_v9, %v1411_v6  ;;  %v2077_v10 = vpop.f32.mrb[62].mxu1 }
 0x236   : > { %v1423_v11 = vadd.f32 %v2077_v10, %v1783_v9  ;;  %v1414_v12 = vpop.f32.mrb[63].mxu1  ;;  %v1464_v14 = vmax.f32 %v1420_v5, 0.0 }
 0x237   : > { %v1415_v13 = vadd.f32 %v1783_v9, %v1414_v12  ;;  %v1462_v15 = vmax.f32 %v1412_v7, 0.0 }
 0x238   : > { %v1465_v35 = vmax.f32 %v1423_v11, 0.0 }
 0x239   : > { %v1463_v16 = vmax.f32 %v1415_v13, 0.0 }
 0x23a   : > { %v1477_v51 = vpack.c.bf16 %v1465_v35, %v1464_v14 }
 0x23b   : > { %v1476_v17 = vpack.c.bf16 %v1463_v16, %v1462_v15 }
 0x23d   : > { %2098 = vmatprep.mubr.msk.bf16.mxu0 %vm1521_vm1, %v1476_v17 }
 0x23e   : > { %2099 = vmatmul.mubr.msk.bf16.gmra.mrb[60].mxu0 %vm1521_vm1, %v1477_v51 }
 0x243   : > { %v2080_v37 = vpop.f32.mrb[64].mxu1 }
 0x244   : > { %v1436_v52 = vadd.f32 %v2080_v37, %v1783_v9  ;;  %v1427_v22 = vpop.f32.mrb[65].mxu1 }
 0x245   : > { %v1428_v23 = vadd.f32 %v1783_v9, %v1427_v22  ;;  %v2081_v24 = vpop.f32.mrb[66].mxu1 }
 0x246   : > { %v1439_v25 = vadd.f32 %v2081_v24, %v1783_v9  ;;  %v1430_v26 = vpop.f32.mrb[67].mxu1  ;;  %v1468_v28 = vmax.f32 %v1436_v52, 0.0 }
 0x247   : > { %v1431_v27 = vadd.f32 %v1783_v9, %v1430_v26  ;;  %v1466_v30 = vmax.f32 %v1428_v23, 0.0 }
 0x248   : > { %v1469_v29 = vmax.f32 %v1439_v25, 0.0 }
 0x249   : > { %v1467_v31 = vmax.f32 %v1431_v27, 0.0 }
 0x24a   : > { %v1479_v32 = vpack.c.bf16 %v1469_v29, %v1468_v28 }
 0x24b   : > { %v1478_v33 = vpack.c.bf16 %v1467_v31, %v1466_v30  ;;  %v2084_v54 = vpop.f32.mrb[68].mxu1 }
 0x24c   : > { %v1452_v3 = vadd.f32 %v2084_v54, %v1783_v9  ;;  %v1443_v34 = vpop.f32.mrb[69].mxu1 }
 0x24d   : > { %v1444_v38 = vadd.f32 %v1783_v9, %v1443_v34  ;;  %v2085_v55 = vpop.f32.mrb[70].mxu1  ;;  %2102 = vmatprep.mubr.msk.bf16.mxu0 %vm1521_vm1, %v1478_v33 }
 0x24e   : > { %v1455_v39 = vadd.f32 %v2085_v55, %v1783_v9  ;;  %v1446_v4 = vpop.f32.mrb[71].mxu1  ;;  %2103 = vmatmul.mubr.msk.bf16.gmra.mrb[64].mxu0 %vm1521_vm1, %v1479_v32  ;;  %v1472_v41 = vmax.f32 %v1452_v3, 0.0 }
 0x24f   : > { %v1447_v40 = vadd.f32 %v1783_v9, %v1446_v4  ;;  %v1470_v43 = vmax.f32 %v1444_v38, 0.0 }
 0x250   : > { %v1473_v42 = vmax.f32 %v1455_v39, 0.0 }
 0x251   : > { %v1471_v18 = vmax.f32 %v1447_v40, 0.0 }
 0x252   : > { %v1481_v44 = vpack.c.bf16 %v1473_v42, %v1472_v41 }
 0x253   : > { %v1480_v45 = vpack.c.bf16 %v1471_v18, %v1470_v43 }
 0x255   : > { %2106 = vmatprep.mubr.msk.bf16.mxu0 %vm1521_vm1, %v1480_v45 }
 0x256   : > { %2107 = vmatmul.mubr.msk.bf16.gmra.mrb[68].mxu0 %vm1521_vm1, %v1481_v44 }
 0x307   : > { %v2096_v46 = vpop.f32.mrb[56].mxu0 }
 0x308   : > { %v1589_v47 = vadd.f32 %v2096_v46, %v1792_v0  ;;  %v1580_v48 = vpop.f32.mrb[57].mxu0 }
 0x309   : > { %v1581_v49 = vadd.f32 %v1792_v0, %v1580_v48  ;;  %v2097_v8 = vpop.f32.mrb[58].mxu0 }
 0x30a   : > { %1646 = vst.msk [vmem:[%s2652_s14 + $0x10] sm:$0xff] %vm1643_vm2, %v1589_v47  ;;  %v1592_v1 = vadd.f32 %v2097_v8, %v1792_v0  ;;  %v1583_v9 = vpop.f32.mrb[59].mxu0 }
 0x30b   : > { %1644 = vst.msk [vmem:[%s2652_s14] sm:$0xff] %vm1643_vm2, %v1581_v49  ;;  %v1584_v21 = vadd.f32 %v1792_v0, %v1583_v9 }
 0x30c   : > { %1647 = vst.msk [vmem:[%s2652_s14 + $0x18] sm:$0xff] %vm1643_vm2, %v1592_v1 }
 0x30d   : > { %1645 = vst.msk [vmem:[%s2652_s14 + $0x8] sm:$0xff] %vm1643_vm2, %v1584_v21 }
 0x311   : > { %v2100_v50 = vpop.f32.mrb[60].mxu0 }
 0x312   : > { %v1605_v53 = vadd.f32 %v2100_v50, %v1792_v0  ;;  %v1596_v56 = vpop.f32.mrb[61].mxu0 }
 0x313   : > { %v1597_v57 = vadd.f32 %v1792_v0, %v1596_v56  ;;  %v2101_v19 = vpop.f32.mrb[62].mxu0 }
 0x314   : > { %1650 = vst.msk [vmem:[%s2652_s14 + $0x30] sm:$0xff] %vm1643_vm2, %v1605_v53  ;;  %v1608_v58 = vadd.f32 %v2101_v19, %v1792_v0  ;;  %v1599_v59 = vpop.f32.mrb[63].mxu0 }
 0x315   : > { %1648 = vst.msk [vmem:[%s2652_s14 + $0x20] sm:$0xff] %vm1643_vm2, %v1597_v57  ;;  %v1600_v20 = vadd.f32 %v1792_v0, %v1599_v59 }
 0x316   : > { %1651 = vst.msk [vmem:[%s2652_s14 + $0x38] sm:$0xff] %vm1643_vm2, %v1608_v58 }
 0x317   : > { %1649 = vst.msk [vmem:[%s2652_s14 + $0x28] sm:$0xff] %vm1643_vm2, %v1600_v20 }
 0x321   : > { %v2104_v60 = vpop.f32.mrb[64].mxu0 }
 0x322   : > { %v1621_v61 = vadd.f32 %v2104_v60, %v1792_v0  ;;  %v1612_v62 = vpop.f32.mrb[65].mxu0 }
 0x323   : > { %v1613_v63 = vadd.f32 %v1792_v0, %v1612_v62  ;;  %v2105_v36 = vpop.f32.mrb[66].mxu0 }
 0x324   : > { %1654 = vst.msk [vmem:[%s2652_s14 + $0x50] sm:$0xff] %vm1643_vm2, %v1621_v61  ;;  %v1624_v2 = vadd.f32 %v2105_v36, %v1792_v0  ;;  %v1615_v5 = vpop.f32.mrb[67].mxu0 }
 0x325   : > { %1652 = vst.msk [vmem:[%s2652_s14 + $0x40] sm:$0xff] %vm1643_vm2, %v1613_v63  ;;  %v1616_v6 = vadd.f32 %v1792_v0, %v1615_v5 }
 0x326   : > { %1655 = vst.msk [vmem:[%s2652_s14 + $0x58] sm:$0xff] %vm1643_vm2, %v1624_v2 }
 0x327   : > { %1653 = vst.msk [vmem:[%s2652_s14 + $0x48] sm:$0xff] %vm1643_vm2, %v1616_v6 }
 0x329   : > { %v2108_v7 = vpop.f32.mrb[68].mxu0 }
 0x32a   : > { %v1637_v10 = vadd.f32 %v2108_v7, %v1792_v0  ;;  %v1628_v11 = vpop.f32.mrb[69].mxu0 }
 0x32b   : > { %v1629_v12 = vadd.f32 %v1792_v0, %v1628_v11  ;;  %v2109_v13 = vpop.f32.mrb[70].mxu0 }
 0x32c   : > { %1658 = vst.msk [vmem:[%s2652_s14 + $0x70] sm:$0xff] %vm1643_vm2, %v1637_v10  ;;  %v1640_v14 = vadd.f32 %v2109_v13, %v1792_v0  ;;  %v1631_v35 = vpop.f32.mrb[71].mxu0 }
 0x32d   : > { %1656 = vst.msk [vmem:[%s2652_s14 + $0x60] sm:$0xff] %vm1643_vm2, %v1629_v12  ;;  %v1632_v15 = vadd.f32 %v1792_v0, %v1631_v35 }
 0x32e   : > { %1659 = vst.msk [vmem:[%s2652_s14 + $0x78] sm:$0xff] %vm1643_vm2, %v1640_v14 }
 0x32f   : > { %1657 = vst.msk [vmem:[%s2652_s14 + $0x68] sm:$0xff] %vm1643_vm2, %v1632_v15 }
 0x330 PF: > { %s17_s24 = sadd.s32 1, %s2202_s24  }
 0x331   : > { %p14_p4 = scmp.ge.s32.totalorder %s17_s24, 4  }
 0x333   :  { %16 = sbr.rel (!%p14_p4) target bundleno = 1 (0x1), region = 78 }

</bundles_post_ra>
